<compile_context>
chip_gen: v6e
topology: v6e:2x2x1
jax: 0.10.0
libtpu: 0.0.40
codegen_flags: <defaults>
</compile_context>

<pallas_src>
import functools

import jax
import jax.numpy as jnp
from jax.experimental import pallas as pl
from jax.experimental.pallas import tpu as pltpu


def _scale_kernel(lr_mult, scale_ref, x_ref, o_ref):
    # scale_ref: (1,) f32 in SMEM.  Compute |scale * lr_mult| in f32, then cast
    # to the activation dtype so bf16 tiles stay bf16 (no f32 promotion of the
    # whole tile).
    s = jnp.abs(scale_ref[0] * lr_mult).astype(x_ref.dtype)
    o_ref[...] = x_ref[...] * s


# Candidate lane-dense slab widths (multiples of 128), widest first.
_SLAB_WIDTHS = (4096, 2048, 1024, 512, 256, 128)
# ~2 MiB per block: double-buffered in+out stays well under scoped VMEM limits
# on all generations (incl. v7x's 64 MiB physical VMEM) while sitting on the
# mem-bound throughput plateau.
_TARGET_BLOCK_BYTES = 2 * 1024 * 1024


def scale_layer_forward(x, scale, lr_mult=1.0):
    """y = x * |scale * lr_mult|  (ScaleLayer forward).

    x: any-shape float tensor (e.g. NCHW activations). scale: (1,) float32.
    """
    orig_shape = x.shape
    n = x.size
    dtype = x.dtype

    # Widest slab width that evenly divides the tensor => reshape is free.
    width = None
    for w in _SLAB_WIDTHS:
        if n % w == 0:
            width = w
            break

    x_flat = x.reshape(-1)
    pad = 0
    if width is None:
        # Rare fallback: element count not a multiple of 128 -> pad the tail.
        # TODO(synk): handle the <128-element tail outside the kernel to avoid
        # the padding copy on oddly-sized tensors.
        width = 128
        pad = (-n) % width
        x_flat = jnp.pad(x_flat, (0, pad))

    rows = x_flat.size // width
    x2d = x_flat.reshape(rows, width)

    # Rows per block: ~_TARGET_BLOCK_BYTES, multiple of 8 (sublane tiling),
    # or the full row count (always a legal block dim).
    bytes_per_row = width * dtype.itemsize
    if rows <= 8:
        tr = rows
    else:
        tr = max(8, ((_TARGET_BLOCK_BYTES // bytes_per_row) // 8) * 8)
        if tr >= rows:
            tr = rows

    grid = (pl.cdiv(rows, tr),)

    kernel = functools.partial(_scale_kernel, float(lr_mult))

    out2d = pl.pallas_call(
        kernel,
        out_shape=jax.ShapeDtypeStruct((rows, width), dtype),
        grid=grid,
        in_specs=[
            pl.BlockSpec(memory_space=pltpu.SMEM),        # (1,) scalar param
            pl.BlockSpec((tr, width), lambda i: (i, 0)),  # lane-dense tile
        ],
        out_specs=pl.BlockSpec((tr, width), lambda i: (i, 0)),
        compiler_params=pltpu.CompilerParams(
            dimension_semantics=("parallel",),            # v7x: 2 TCs split rows
            vmem_limit_bytes=32 * 1024 * 1024,
        ),
    )(scale, x2d)

    out_flat = out2d.reshape(-1)
    if pad:
        out_flat = out_flat[:n]
    return out_flat.reshape(orig_shape)


if __name__ == "__main__":
    # Parameter init matching nn.Parameter(torch.full((1,), init_value / lr_mult))
    init_value = 1.0
    lr_mult = 1.0
    scale_param = jnp.full((1,), init_value / lr_mult, dtype=jnp.float32)

    key = jax.random.PRNGKey(0)
    x = jax.random.normal(key, (2, 4, 16, 16), dtype=jnp.float32)  # NCHW

    # f32 path
    y = scale_layer_forward(x, scale_param, lr_mult=lr_mult)
    y = jax.block_until_ready(y)
    y_ref = x * jnp.abs(scale_param[0] * lr_mult)
    assert y.shape == x.shape and y.dtype == x.dtype
    assert jnp.allclose(y, y_ref, atol=1e-6, rtol=1e-6)

    # bf16 path (exercise the in-dtype multiply / scalar cast)
    x_bf16 = x.astype(jnp.bfloat16)
    y_bf16 = jax.block_until_ready(
        scale_layer_forward(x_bf16, scale_param, lr_mult=lr_mult)
    )
    y_bf16_ref = x_bf16 * jnp.abs(scale_param[0] * lr_mult).astype(jnp.bfloat16)
    assert y_bf16.dtype == jnp.bfloat16
    assert jnp.allclose(
        y_bf16.astype(jnp.float32), y_bf16_ref.astype(jnp.float32),
        atol=1e-2, rtol=1e-2,
    )

    print("KERNEL_OK")
</pallas_src>

<mosaic_0001>
module attributes {stable_mosaic.version = 11 : i64} {
  func.func @_scale_kernel(%arg0: i32, %arg1: memref<1xf32, #tpu.memory_space<smem>>, %arg2: memref<1x2048xf32, #tpu.memory_space<vmem>>, %arg3: memref<1x2048xf32, #tpu.memory_space<vmem>>) attributes {dimension_semantics = [#tpu.dimension_semantics<parallel>], iteration_bounds = array<i64: 1>, scalar_prefetch = 0 : i64, scratch_operands = 0 : i64, tpu.core_type = #tpu.core_type<tc>, window_params = [{transform_indices = @transform_0, window_bounds = array<i64: 1>}, {transform_indices = @transform_1, window_bounds = array<i64: 1, 2048>}, {transform_indices = @transform_2, window_bounds = array<i64: 1, 2048>}]} {
    %c0 = arith.constant 0 : index
    %0 = memref.load %arg1[%c0] : memref<1xf32, #tpu.memory_space<smem>>
    %cst = arith.constant 1.000000e+00 : f32
    %1 = arith.mulf %0, %cst : f32
    %2 = math.absf %1 : f32
    %c0_0 = arith.constant 0 : index
    %c0_1 = arith.constant 0 : index
    %3 = vector.load %arg2[%c0_0, %c0_1] : memref<1x2048xf32, #tpu.memory_space<vmem>>, vector<1x2048xf32>
    %4 = vector.broadcast %2 : f32 to vector<1x2048xf32>
    %5 = arith.mulf %3, %4 : vector<1x2048xf32>
    %c0_2 = arith.constant 0 : index
    %c0_3 = arith.constant 0 : index
    %6 = vector.load %arg3[%c0_2, %c0_3] : memref<1x2048xf32, #tpu.memory_space<vmem>>, vector<1x2048xf32>
    tpu.vector_store %arg3[%c0_2, %c0_3], %5 {strides = array<i32>} : memref<1x2048xf32, #tpu.memory_space<vmem>>, vector<1x2048xf32>,
    return
  }
  func.func @transform_0(%arg0: i32) -> i32 {
    %c0_i32 = arith.constant 0 : i32
    %c0_i32_0 = arith.constant 0 : i32
    return %c0_i32 : i32
  }
  func.func @transform_1(%arg0: i32) -> (i32, i32) {
    %c0_i32 = arith.constant 0 : i32
    %c0_i32_0 = arith.constant 0 : i32
    return %arg0, %c0_i32 : i32, i32
  }
  func.func @transform_2(%arg0: i32) -> (i32, i32) {
    %c0_i32 = arith.constant 0 : i32
    %c0_i32_0 = arith.constant 0 : i32
    return %arg0, %c0_i32 : i32, i32
  }
}

</mosaic_0001>

<bundles_post_ra>
// kernel: tpu_custom_call.1
= control target key start
LH: loop header
LB: loop body
LE: loop exit
PB: predicated region body
PF: predicated region fallthrough
CT: control target
= control target key end

     0   :  { %8 = vsyncpa [#allocation4], 0  ;;  %s121_s0 = inlined_call_operand.<no memory space> [shape: f32[1], index: 0, kind: input, shape index: {}]   ;;  %s122_s1 = inlined_call_operand.hbm [shape: f32[1,2048], index: 1, kind: input, shape index: {}]   ;;  %s123_s2 = inlined_call_operand.hbm [shape: f32[1,2048], index: 2, kind: output, shape index: {}]  }
   0x1   :  { %9 = vsyncpa [#allocation5], 0  ;;  %s95_s9 = smov [#allocation3]  }
   0x2   :  { %s18_s10 = sshll.u32 %s95_s9, 4  ;;  %s19_s10 = int_to_ptr.vmem [resolvable:$true] %s18_s10 }
   0x3   :  { %s59_s11 = scalar_lea.vmem %s19_s10, 256  ;;  %p64_p1 = scmp.lt.s32.totalorder %s19_s10, %s19_s10 }
   0x4   :  { %p60_p0 = scmp.ne.s32.totalorder %s19_s10, %s59_s11  ;;  %p65_p2 = scmp.lt.s32.totalorder %s59_s11, %s59_s11 }
   0x6   :  { %p66_p3 = por %p65_p2, %p64_p1 }
   0x8   :  { %p67_p4 = pnand %p66_p3, %p60_p0 }
   0xa   :  { %70 = shalt.err (!%p67_p4)
}
   0xb   :  { %21 = dma.hbm_to_vmem [thread:$0]  %s122_s1, 256, %s19_s10, [#allocation4]  }
   0xc   :  { %91 = dma.done.wait [#allocation4], 256  }
   0xd   :  { %92 = vsyncadd [#allocation4], 4294967040  ;;  %s26_s16 = sand.u32 2147483647, %s121_s0  ;;  %s96_s17 = smov [#allocation6]   ;;  %v27_v1 = vld [vmem:[#allocation3] sm:$0xff] }
   0xe   :  { %v29_v0 = vstv %s26_s16  ;;  %s40_s18 = sshll.u32 %s96_s17, 4  ;;  %v28_v2 = vld [vmem:[#allocation3 + $0x8] sm:$0xff]  ;;  %s41_s18 = int_to_ptr.vmem [resolvable:$true] %s40_s18 }
   0xf   :  { %v30_v3 = vmul.f32 %v29_v0, %v27_v1  ;;  %v31_v4 = vmul.f32 %v29_v0, %v28_v2  ;;  %s71_s19 = scalar_lea.vmem %s41_s18, 256  ;;  %p76_p6 = scmp.lt.s32.totalorder %s41_s18, %s41_s18 }
  0x10   :  { %p72_p5 = scmp.ne.s32.totalorder %s41_s18, %s71_s19  ;;  %p77_p7 = scmp.lt.s32.totalorder %s71_s19, %s71_s19 }
  0x11   :  { %32 = vst [vmem:[#allocation6] sm:$0xff] %v30_v3  ;;  %33 = vst [vmem:[#allocation6 + $0x8] sm:$0xff] %v31_v4 }
  0x12   :  { %p78_p8 = por %p77_p7, %p76_p6 }
  0x14   :  { %p79_p9 = pnand %p78_p8, %p72_p5 }
  0x16   :  { %82 = shalt.err (!%p79_p9)
}
  0x17   :  { %43 = dma.vmem_to_hbm [thread:$0]  %s41_s18, 256, %s123_s2, [#allocation5]  }
  0x18   :  { %93 = dma.done.wait [#allocation5], 256  }
  0x19   :  { %94 = vsyncadd [#allocation5], 4294967040 }
  0x1a   :  { %47 = vsyncpa [#allocation4], 1 }
  0x1b   :  { %48 = vsyncpa [#allocation5], 1 }

</bundles_post_ra>
